<compile_context>
chip_gen: v7x
topology: tpu7x:2x2x1
jax: 0.10.0
libtpu: 0.0.40
codegen_flags: <defaults>
</compile_context>

<pallas_src>
import jax
import jax.numpy as jnp
from jax.experimental import pallas as pl
from jax.experimental.pallas import tpu as pltpu

_LANES = 128
_SUBLANES = 8


def _square_kernel(x_ref, o_ref):
    # One VPU vmul per vreg; DMA/HBM path is the bottleneck, body stays trivial.
    x = x_ref[...]
    o_ref[...] = x * x


def _pick_tile_rows(rows: int, max_rows: int):
    """Largest tile_rows that evenly tiles `rows`, satisfies the (8,128) block
    constraint (multiple of 8, or full extent), and fits the VMEM budget.
    Returns None if no such tiling exists (then the padded fallback is used)."""
    if rows <= max_rows:
        return rows  # single full-extent block: always legal
    start = (max_rows // _SUBLANES) * _SUBLANES
    for cand in range(start, 0, -_SUBLANES):
        if rows % cand == 0:
            return cand
    return None


def square_layer(x: jax.Array, *, max_block_bytes: int = 2 * 1024 * 1024) -> jax.Array:
    """Elementwise square, matching torch `x ** 2` exactly (same shape/dtype)."""
    orig_shape = x.shape
    dtype = x.dtype
    n = x.size
    if n == 0:
        return x

    itemsize = jnp.dtype(dtype).itemsize
    # Rows per block so that one block is ~max_block_bytes (2 MiB default).
    # Double-buffered input + output => ~4x that in VMEM, safe on v5e/v6e/v7x
    # without raising the scoped VMEM limit.
    max_rows = max(_SUBLANES, max_block_bytes // (_LANES * itemsize))

    cost = pl.CostEstimate(
        flops=n, transcendentals=0, bytes_accessed=2 * n * itemsize
    )

    def run(x2d: jax.Array, tile_rows: int) -> jax.Array:
        rows = x2d.shape[0]
        grid = (rows // tile_rows,)
        return pl.pallas_call(
            _square_kernel,
            out_shape=jax.ShapeDtypeStruct((rows, _LANES), dtype),
            grid_spec=pltpu.PrefetchScalarGridSpec(
                num_scalar_prefetch=0,
                grid=grid,
                in_specs=[pl.BlockSpec((tile_rows, _LANES), lambda i: (i, 0))],
                out_specs=pl.BlockSpec((tile_rows, _LANES), lambda i: (i, 0)),
            ),
            compiler_params=pltpu.CompilerParams(
                dimension_semantics=("parallel",)
            ),
            cost_estimate=cost,
        )(x2d)

    # Fast path: no padding, no trailing slice — the reshape to a lane-dense
    # (rows, 128) slab is a free layout change, so the only HBM traffic is the
    # kernel's own read + write.
    if n % _LANES == 0:
        rows = n // _LANES
        tile_rows = _pick_tile_rows(rows, max_rows)
        if tile_rows is not None:
            x2d = x.reshape(rows, _LANES)
            return run(x2d, tile_rows).reshape(orig_shape)

    # Fallback (rare: size not divisible by 128, or no usable row divisor):
    # pad the flat tail to a tile boundary, run, strip. Squaring zero padding
    # is exact, so this only costs extra HBM traffic, never correctness.
    tile_rows = max(_SUBLANES, (max_rows // _SUBLANES) * _SUBLANES)
    rows_needed = -(-n // _LANES)
    rows_padded = -(-rows_needed // tile_rows) * tile_rows
    n_padded = rows_padded * _LANES
    x_flat = jnp.ravel(x)
    x_flat = jnp.pad(x_flat, (0, n_padded - n))
    out2d = run(x_flat.reshape(rows_padded, _LANES), tile_rows)
    return out2d.reshape(-1)[:n].reshape(orig_shape)


if __name__ == "__main__":
    key = jax.random.PRNGKey(0)
    # Small NCHW-style input consistent with SCCNet usage (batch, ch, H, W).
    x = jax.random.normal(key, (2, 4, 16, 16), dtype=jnp.float32)

    y = square_layer(x)
    jax.block_until_ready(y)

    # Correctness check against plain JAX reference (bit-exact for x*x).
    ref = x ** 2
    assert y.shape == x.shape and y.dtype == x.dtype
    assert jnp.allclose(y, ref, atol=0.0, rtol=0.0), "mismatch vs reference"

    print("KERNEL_OK")
</pallas_src>

<mosaic_0001>
module attributes {stable_mosaic.version = 11 : i64} {
  func.func @_square_kernel(%arg0: i32, %arg1: memref<16x128xf32, #tpu.memory_space<vmem>>, %arg2: memref<16x128xf32, #tpu.memory_space<vmem>>) attributes {dimension_semantics = [#tpu.dimension_semantics<parallel>], iteration_bounds = array<i64: 1>, scalar_prefetch = 0 : i64, scratch_operands = 0 : i64, tpu.core_type = #tpu.core_type<tc>, window_params = [{transform_indices = @transform_0, window_bounds = array<i64: 16, 128>}, {transform_indices = @transform_1, window_bounds = array<i64: 16, 128>}]} {
    %c0 = arith.constant 0 : index
    %c0_0 = arith.constant 0 : index
    %0 = vector.load %arg1[%c0, %c0_0] : memref<16x128xf32, #tpu.memory_space<vmem>>, vector<16x128xf32>
    %1 = arith.mulf %0, %0 : vector<16x128xf32>
    %c0_1 = arith.constant 0 : index
    %c0_2 = arith.constant 0 : index
    %2 = vector.load %arg2[%c0_1, %c0_2] : memref<16x128xf32, #tpu.memory_space<vmem>>, vector<16x128xf32>
    tpu.vector_store %arg2[%c0_1, %c0_2], %1 {strides = array<i32>} : memref<16x128xf32, #tpu.memory_space<vmem>>, vector<16x128xf32>,
    return
  }
  func.func @transform_0(%arg0: i32) -> (i32, i32) {
    %c0_i32 = arith.constant 0 : i32
    %c0_i32_0 = arith.constant 0 : i32
    return %arg0, %c0_i32 : i32, i32
  }
  func.func @transform_1(%arg0: i32) -> (i32, i32) {
    %c0_i32 = arith.constant 0 : i32
    %c0_i32_0 = arith.constant 0 : i32
    return %arg0, %c0_i32 : i32, i32
  }
}

</mosaic_0001>

<bundles_post_ra>
// kernel: tpu_custom_call.1
= control target key start
LH: loop header
LB: loop body
LE: loop exit
PB: predicated region body
PF: predicated region fallthrough
CT: control target
= control target key end

     0   :  { %6 = vsyncpa [#allocation3], 0  ;;  %s136_s0 = inlined_call_operand.hbm [shape: f32[16,128], index: 0, kind: input, shape index: {}]   ;;  %s137_s1 = inlined_call_operand.hbm [shape: f32[16,128], index: 1, kind: output, shape index: {}]  }
   0x1   :  { %7 = vsyncpa [#allocation4], 0  ;;  %s98_s6 = smov [#allocation2]   ;;  %s50_s10 = scalar_lea.hbm %s136_s0, 256 }
   0x2   :  { %s13_s7 = sshll.u32 %s98_s6, 4  ;;  %p51_p0 = scmp.ne.s32.totalorder %s136_s0, %s50_s10  ;;  %s14_s7 = int_to_ptr.vmem [resolvable:$true] %s13_s7 }
   0x3   :  { %p54_p1 = scmp.lt.u32.totalorder %s50_s10, %s136_s0 }
   0x5   :  { %p56_p2 = pnand %p54_p1, %p51_p0 }
   0x7   :  { %59 = shalt.err (!%p56_p2)
}
   0x8   :  { %s60_s15 = scalar_lea.vmem %s14_s7, 256  ;;  %p65_p4 = scmp.lt.s32.totalorder %s14_s7, %s14_s7 }
   0x9   :  { %p61_p3 = scmp.ne.s32.totalorder %s14_s7, %s60_s15  ;;  %p66_p5 = scmp.lt.s32.totalorder %s60_s15, %s60_s15 }
   0xb   :  { %p67_p6 = por %p66_p5, %p65_p4 }
   0xd   :  { %p68_p7 = pnand %p67_p6, %p61_p3 }
   0xf   :  { %71 = shalt.err (!%p68_p7)
}
  0x10   :  { %s99_s16 = smov 128   ;;  %s100_s17 = smov 8  }
  0x11   :  { %19 = dma.hbm_to_vmem [thread:$0]  %s136_s0, 256, %s14_s7, [#allocation3], %s99_s16, %s99_s16, %s100_s17  }
  0x12   :  { %94 = dma.done.wait [#allocation3], 256  }
  0x13   :  { %95 = vsyncadd [#allocation3], 4294967040  ;;  %s101_s20 = smov [#allocation5]   ;;  %v23_v0 = vld [vmem:[#allocation2] sm:$0xff]  ;;  %v24_v1 = vld [vmem:[#allocation2 + $0x8] sm:$0xff] }
  0x14   :  { %s34_s21 = sshll.u32 %s101_s20, 4  ;;  %v25_v2 = vmul.f32 %v23_v0, %v23_v0  ;;  %v26_v3 = vmul.f32 %v24_v1, %v24_v1  ;;  %s35_s21 = int_to_ptr.vmem [resolvable:$true] %s34_s21 }
  0x15   :  { %s72_s22 = scalar_lea.vmem %s35_s21, 256  ;;  %p77_p9 = scmp.lt.s32.totalorder %s35_s21, %s35_s21 }
  0x16   :  { %27 = vst [vmem:[#allocation5] sm:$0xff] %v25_v2  ;;  %28 = vst [vmem:[#allocation5 + $0x8] sm:$0xff] %v26_v3  ;;  %p73_p8 = scmp.ne.s32.totalorder %s35_s21, %s72_s22  ;;  %p78_p10 = scmp.lt.s32.totalorder %s72_s22, %s72_s22 }
  0x18   :  { %p79_p11 = por %p78_p10, %p77_p9 }
  0x1a   :  { %p80_p12 = pnand %p79_p11, %p73_p8 }
  0x1c   :  { %83 = shalt.err (!%p80_p12)
}
  0x1d   :  { %s84_s24 = scalar_lea.hbm %s137_s1, 256 }
  0x1e   :  { %p85_p13 = scmp.ne.s32.totalorder %s137_s1, %s84_s24  ;;  %p88_p0 = scmp.lt.u32.totalorder %s84_s24, %s137_s1 }
  0x20   :  { %p90_p1 = pnand %p88_p0, %p85_p13 }
  0x22   :  { %93 = shalt.err (!%p90_p1)
}
  0x23   :  { %40 = dma.vmem_to_hbm [thread:$0]  %s35_s21, 256, %s137_s1, [#allocation4], %s99_s16, %s99_s16, %s100_s17  }
  0x24   :  { %96 = dma.done.wait [#allocation4], 256  }
  0x25   :  { %97 = vsyncadd [#allocation4], 4294967040 }
  0x26   :  { %44 = vsyncpa [#allocation3], 1 }
  0x27   :  { %45 = vsyncpa [#allocation4], 1 }

</bundles_post_ra>
